<compile_context>
chip_gen: v7x
topology: tpu7x:2x2x1
jax: 0.10.0
libtpu: 0.0.40
codegen_flags: <defaults>
</compile_context>

<pallas_src>
import functools

import jax
import jax.numpy as jnp
from jax import lax
from jax.experimental import pallas as pl
from jax.experimental.pallas import tpu as pltpu


def _vmem_capacity_bytes():
    """Best-effort per-core VMEM capacity; conservative fallback if unknown."""
    try:
        info = pltpu.get_tpu_info()
        for attr in ("vmem_capacity_bytes", "vmem_bytes", "vmem_size_bytes"):
            v = getattr(info, attr, None)
            if isinstance(v, int) and v > 0:
                return v
    except Exception:
        pass
    return 64 << 20   # safe for v5e / v6e / v7x


def _pick_tile(n_nodes, emb_dim, itemsize):
    """Largest node tile whose two double-buffered x tiles fit the VMEM budget
    (budget derived per TPU generation)."""
    cap = _vmem_capacity_bytes()
    budget = max(8 << 20, cap // 5)     # bytes for the 2 double-buffered x tiles
    tile = 4096
    while tile > 128 and 2 * tile * emb_dim * itemsize > budget:
        tile //= 2
    if n_nodes <= tile:
        return n_nodes                  # single tile: block == full array extent
    return tile


def _mask_tail(x, step, tile_n, n_nodes):
    """Zero rows past the true node count so uninitialized VMEM in the ragged
    last tile never feeds a matmul (0 * NaN would corrupt the accumulator)."""
    rows = step * tile_n + lax.broadcasted_iota(jnp.int32, (x.shape[0], 1), 0)
    return jnp.where(rows < n_nodes, x, jnp.zeros_like(x))


def _segsum_kernel(seg_ref, x_ref, out_ref, acc_ref, *rest, op, num_segments,
                   n_nodes, tile_n, ragged):
    """Segment sum / mean: one-hot (G, tn) @ x (tn, D) on the MXU per tile."""
    i = pl.program_id(1)
    last = pl.num_programs(1) - 1
    G = num_segments
    cnt_ref = rest[0] if op == 'mean' else None

    @pl.when(i == 0)
    def _():
        acc_ref[...] = jnp.zeros_like(acc_ref)
        if op == 'mean':
            cnt_ref[...] = jnp.zeros_like(cnt_ref)

    x = x_ref[...]                                             # (tn, bd)
    if ragged:
        x = _mask_tail(x, i, tile_n, n_nodes)
    seg = seg_ref[0]                                           # (1, tn) int32
    tn = x.shape[0]
    oh = lax.broadcasted_iota(jnp.int32, (G, tn), 0) == seg    # (G, tn) bool

    acc_ref[...] += jnp.dot(oh.astype(x.dtype), x,
                            preferred_element_type=jnp.float32)
    if op == 'mean':
        cnt_ref[...] += jnp.sum(oh.astype(jnp.float32), axis=1, keepdims=True)

    @pl.when(i == last)
    def _():
        if op == 'sum':
            out_ref[...] = acc_ref[...].astype(out_ref.dtype)
        else:  # 'mean'
            out_ref[...] = (acc_ref[...] /
                            jnp.maximum(cnt_ref[...], 1.0)).astype(out_ref.dtype)


def _segmax_kernel(glo_ref, ghi_ref, seg_ref, x_ref, out_ref, acc_ref):
    """Segment max.  Only graphs present in the tile (scalar-prefetched
    [g_lo, g_hi]) are visited.  Empty segments return 0 (PyTorch zero-init
    scatter semantics); padded rows carry the sentinel id G so they never
    match, and the where-select never multiplies uninitialized tail x."""
    i = pl.program_id(1)
    last = pl.num_programs(1) - 1
    neg_inf = jnp.float32(-jnp.inf)

    @pl.when(i == 0)
    def _():
        acc_ref[...] = jnp.full(acc_ref.shape, -jnp.inf, acc_ref.dtype)

    x = x_ref[...].astype(jnp.float32)                         # (tn, bd)
    seg = seg_ref[...]                                         # (tn, 1) int32
    g_lo = glo_ref[i]
    g_hi = ghi_ref[i]

    def body(g, carry):
        row = jnp.max(jnp.where(seg == g, x, neg_inf), axis=0, keepdims=True)
        acc_ref[pl.ds(g, 1), :] = jnp.maximum(acc_ref[pl.ds(g, 1), :], row)
        return carry

    lax.fori_loop(g_lo, g_hi + 1, body, 0)

    @pl.when(i == last)
    def _():
        acc = acc_ref[...]
        out_ref[...] = jnp.where(acc == neg_inf, jnp.zeros_like(acc),
                                 acc).astype(out_ref.dtype)


def _attention_kernel(seg_ref, x_ref, w_ref, out_ref, m_ref, l_ref, acc_ref, *,
                      num_segments, n_nodes, tile_n, ragged):
    """GlobalAttention (gate_nn = Linear(D, 1), nn = None):
         gate = x @ w (+ b, which cancels in the per-graph softmax and is
         therefore dropped); per-graph softmax(gate); out[g] = sum softmax * x.
    Online per-graph softmax over node tiles with graphs on sublanes; the
    numerator is a softmax-weighted (G, tn) @ (tn, D) MXU matmul."""
    i = pl.program_id(1)
    last = pl.num_programs(1) - 1
    G = num_segments
    neg_inf = jnp.float32(-jnp.inf)

    @pl.when(i == 0)
    def _():
        m_ref[...] = jnp.full(m_ref.shape, -jnp.inf, m_ref.dtype)
        l_ref[...] = jnp.zeros_like(l_ref)
        acc_ref[...] = jnp.zeros_like(acc_ref)

    x = x_ref[...]                                             # (tn, D)
    if ragged:
        x = _mask_tail(x, i, tile_n, n_nodes)
    seg = seg_ref[0]                                           # (1, tn) int32
    tn = x.shape[0]
    oh = lax.broadcasted_iota(jnp.int32, (G, tn), 0) == seg    # (G, tn) bool

    # gate row (1, tn) = w (1, D) . x (tn, D)^T, f32 throughout.
    gate = lax.dot_general(w_ref[...], x.astype(jnp.float32),
                           (((1,), (1,)), ((), ())),
                           preferred_element_type=jnp.float32)  # (1, tn)

    masked = jnp.where(oh, gate, neg_inf)                       # (G, tn)
    tile_max = jnp.max(masked, axis=1, keepdims=True)           # (G, 1)
    m_old = m_ref[...]
    m_new = jnp.maximum(m_old, tile_max)                        # (G, 1)
    corr = jnp.where(m_new == neg_inf, 0.0, jnp.exp(m_old - m_new))   # (G, 1)
    p = jnp.where(oh, jnp.exp(gate - m_new), 0.0)               # (G, tn) f32

    l_ref[...] = corr * l_ref[...] + jnp.sum(p, axis=1, keepdims=True)
    acc_ref[...] = corr * acc_ref[...] + jnp.dot(
        p.astype(x.dtype), x, preferred_element_type=jnp.float32)      # (G, D)
    m_ref[...] = m_new

    @pl.when(i == last)
    def _():
        out_ref[...] = (acc_ref[...] / (l_ref[...] + 1e-16)).astype(out_ref.dtype)


class GlobalReadout:
    """Pallas/TPU port of pyskl GlobalReadout (graph readout over segment ids)."""

    def __init__(self, emb_dim=300, read_op='sum', key=None):
        self.emb_dim = emb_dim
        self.read_op = read_op
        if read_op == 'attention':
            key = jax.random.PRNGKey(1) if key is None else key
            kw, kb = jax.random.split(key)
            bound = 1.0 / (emb_dim ** 0.5)   # torch.nn.Linear default init range
            self.gate_w = jax.random.uniform(kw, (1, emb_dim), jnp.float32,
                                             -bound, bound)
            # Bias kept for parity with the PyTorch module; it cancels in the
            # per-graph softmax so the kernel does not consume it.
            self.gate_b = jax.random.uniform(kb, (1, 1), jnp.float32,
                                             -bound, bound)
        elif read_op == 'set2set':
            # TODO(synk): Set2Set readout (LSTM recurrence over graphs) is not
            # implemented as a Pallas kernel.
            raise NotImplementedError("set2set readout not implemented")
        elif read_op not in ('sum', 'mean', 'max'):
            raise ValueError('Invalid graph readout type.')

    def __call__(self, x, batch, size=None, tile_n=None):
        N, D = x.shape
        assert D == self.emb_dim
        batch = jnp.asarray(batch).astype(jnp.int32).reshape(-1)
        if size is None:
            # NOTE: device->host sync, not jit-traceable; pass `size` explicitly
            # in performance-critical / jitted code.
            size = int(jax.device_get(jnp.max(batch))) + 1
        G = int(size)

        itemsize = jnp.dtype(x.dtype).itemsize
        if tile_n is None:
            tile_n = _pick_tile(N, D, itemsize)
        tile_n = int(tile_n)
        if tile_n >= N:
            tile_n = N
        else:
            tile_n = -(-tile_n // 8) * 8
            if tile_n >= N:
                tile_n = N
        grid_n = -(-N // tile_n)
        n_pad = grid_n * tile_n
        ragged = n_pad != N

        # Optional D split: lets a second TensorCore (v7x megacore) share the
        # one-hot reductions.  Attention needs the full D row for the gate.
        d_blocks = 2 if (self.read_op != 'attention'
                         and D >= 256 and D % 256 == 0) else 1
        block_d = D // d_blocks
        grid = (d_blocks, grid_n)

        cap = _vmem_capacity_bytes()
        cparams = pltpu.CompilerParams(
            dimension_semantics=("parallel", "arbitrary"),
            vmem_limit_bytes=int(max(32 << 20, min(cap * 3 // 4, 100 << 20))))

        out_shape = jax.ShapeDtypeStruct((G, D), x.dtype)
        # Only the tiny id vector is padded (sentinel G so padded rows never
        # match any graph); x is passed unpadded and the ragged tail is masked
        # in-kernel.
        ids = jnp.full((n_pad,), G, jnp.int32).at[:N].set(batch)
        bytes_accessed = N * D * itemsize + n_pad * 4 + G * D * itemsize

        if self.read_op in ('sum', 'mean'):
            seg_row = ids.reshape(grid_n, 1, tile_n)   # lane-dense id blocks
            kernel = functools.partial(
                _segsum_kernel, op=self.read_op, num_segments=G,
                n_nodes=N, tile_n=tile_n, ragged=ragged)
            scratch = [pltpu.VMEM((G, block_d), jnp.float32)]
            if self.read_op == 'mean':
                scratch.append(pltpu.VMEM((G, 1), jnp.float32))
            return pl.pallas_call(
                kernel,
                out_shape=out_shape,
                grid_spec=pltpu.PrefetchScalarGridSpec(
                    num_scalar_prefetch=0, grid=grid,
                    in_specs=[
                        pl.BlockSpec((1, 1, tile_n), lambda d, i: (i, 0, 0)),
                        pl.BlockSpec((tile_n, block_d), lambda d, i: (i, d)),
                    ],
                    out_specs=pl.BlockSpec((G, block_d), lambda d, i: (0, d)),
                    scratch_shapes=scratch),
                compiler_params=cparams,
                cost_estimate=pl.CostEstimate(
                    flops=2 * N * D * G, transcendentals=0,
                    bytes_accessed=bytes_accessed),
            )(seg_row, x)

        if self.read_op == 'max':
            seg_col = ids.reshape(n_pad, 1)
            ids_hi = jnp.full((n_pad,), -1, jnp.int32).at[:N].set(batch)
            g_lo = jnp.min(ids.reshape(grid_n, tile_n), axis=1)     # (grid_n,)
            g_hi = jnp.max(ids_hi.reshape(grid_n, tile_n), axis=1)  # (grid_n,)
            return pl.pallas_call(
                _segmax_kernel,
                out_shape=out_shape,
                grid_spec=pltpu.PrefetchScalarGridSpec(
                    num_scalar_prefetch=2, grid=grid,
                    in_specs=[
                        pl.BlockSpec((tile_n, 1), lambda d, i, lo, hi: (i, 0)),
                        pl.BlockSpec((tile_n, block_d),
                                     lambda d, i, lo, hi: (i, d)),
                    ],
                    out_specs=pl.BlockSpec((G, block_d),
                                           lambda d, i, lo, hi: (0, d)),
                    scratch_shapes=[pltpu.VMEM((G, block_d), jnp.float32)]),
                compiler_params=cparams,
                cost_estimate=pl.CostEstimate(
                    flops=N * D, transcendentals=0,
                    bytes_accessed=bytes_accessed),
            )(g_lo, g_hi, seg_col, x)

        # attention (d_blocks == 1)
        seg_row = ids.reshape(grid_n, 1, tile_n)
        kernel = functools.partial(_attention_kernel, num_segments=G,
                                   n_nodes=N, tile_n=tile_n, ragged=ragged)
        return pl.pallas_call(
            kernel,
            out_shape=out_shape,
            grid_spec=pltpu.PrefetchScalarGridSpec(
                num_scalar_prefetch=0, grid=grid,
                in_specs=[
                    pl.BlockSpec((1, 1, tile_n), lambda d, i: (i, 0, 0)),
                    pl.BlockSpec((tile_n, D), lambda d, i: (i, 0)),
                    pl.BlockSpec((1, D), lambda d, i: (0, 0)),
                ],
                out_specs=pl.BlockSpec((G, D), lambda d, i: (0, 0)),
                scratch_shapes=[pltpu.VMEM((G, 1), jnp.float32),   # running max
                                pltpu.VMEM((G, 1), jnp.float32),   # running denom
                                pltpu.VMEM((G, D), jnp.float32)]), # running numer
            compiler_params=cparams,
            cost_estimate=pl.CostEstimate(
                flops=2 * N * D * (G + 1), transcendentals=n_pad * G,
                bytes_accessed=bytes_accessed + D * 4),
        )(seg_row, x, self.gate_w)


def _ref_readout(x, batch, G, read_op, gate_w=None, gate_b=None):
    """Pure-JAX reference matching the PyTorch scatter semantics."""
    if read_op == 'sum':
        return jax.ops.segment_sum(x, batch, num_segments=G)
    if read_op == 'mean':
        s = jax.ops.segment_sum(x, batch, num_segments=G)
        c = jax.ops.segment_sum(jnp.ones((x.shape[0], 1), x.dtype), batch,
                                num_segments=G)
        return s / jnp.maximum(c, 1.0)
    if read_op == 'max':
        return jax.ops.segment_max(x, batch, num_segments=G)
    if read_op == 'attention':
        gate = x @ gate_w.T + gate_b                               # (N, 1)
        m = jax.ops.segment_max(gate, batch, num_segments=G)
        p = jnp.exp(gate - m[batch])
        denom = jax.ops.segment_sum(p, batch, num_segments=G)[batch] + 1e-16
        soft = p / denom
        return jax.ops.segment_sum(soft * x, batch, num_segments=G)
    raise ValueError(read_op)


if __name__ == "__main__":
    key = jax.random.PRNGKey(0)
    kx, kb = jax.random.split(key)

    # --- case 1: single tile (16 nodes, emb_dim=32, 2 graphs) ---------------
    N, D, G = 16, 32, 2
    x = jax.random.normal(kx, (N, D), dtype=jnp.float32)
    batch = jnp.sort(jax.random.randint(kb, (N,), 0, G)).astype(jnp.int32)
    batch = batch.at[0].set(0).at[-1].set(G - 1)   # every graph non-empty

    for op in ('sum', 'mean', 'max', 'attention'):
        mod = GlobalReadout(emb_dim=D, read_op=op)
        out = jax.block_until_ready(mod(x, batch, size=G))
        ref = _ref_readout(x, batch, G, op,
                           getattr(mod, 'gate_w', None),
                           getattr(mod, 'gate_b', None))
        assert out.shape == (G, D), (op, out.shape)
        assert jnp.allclose(out, ref, rtol=1e-4, atol=1e-4), \
            f"mismatch for {op} (single-tile)"

    # --- case 2: multi-tile ragged (300 nodes, tile_n=128 -> grid 3) --------
    N2, D2, G2 = 300, 32, 3
    x2 = jax.random.normal(jax.random.PRNGKey(2), (N2, D2), dtype=jnp.float32)
    batch2 = jnp.concatenate([jnp.zeros((120,), jnp.int32),
                              jnp.ones((90,), jnp.int32),
                              jnp.full((90,), 2, jnp.int32)])

    for op in ('sum', 'mean', 'max', 'attention'):
        mod = GlobalReadout(emb_dim=D2, read_op=op)
        out = jax.block_until_ready(mod(x2, batch2, size=G2, tile_n=128))
        ref = _ref_readout(x2, batch2, G2, op,
                           getattr(mod, 'gate_w', None),
                           getattr(mod, 'gate_b', None))
        assert out.shape == (G2, D2), (op, out.shape)
        assert jnp.allclose(out, ref, rtol=1e-4, atol=1e-4), \
            f"mismatch for {op} (multi-tile)"

    # --- case 3: D % 256 == 0 -> D-split "parallel" grid axis ---------------
    N3, D3, G3 = 300, 256, 3
    x3 = jax.random.normal(jax.random.PRNGKey(3), (N3, D3), dtype=jnp.float32)
    for op in ('sum', 'mean', 'max'):
        mod = GlobalReadout(emb_dim=D3, read_op=op)
        out = jax.block_until_ready(mod(x3, batch2, size=G3, tile_n=128))
        ref = _ref_readout(x3, batch2, G3, op)
        assert out.shape == (G3, D3), (op, out.shape)
        assert jnp.allclose(out, ref, rtol=1e-4, atol=1e-4), \
            f"mismatch for {op} (D-split)"

    print("KERNEL_OK")
</pallas_src>

<mosaic_0001>
module attributes {stable_mosaic.version = 11 : i64} {
  func.func @_segsum_kernel(%arg0: i32, %arg1: i32, %arg2: memref<1x1x16xi32, #tpu.memory_space<vmem>>, %arg3: memref<16x32xf32, #tpu.memory_space<vmem>>, %arg4: memref<2x32xf32, #tpu.memory_space<vmem>>, %arg5: memref<2x32xf32, #tpu.memory_space<vmem>>) attributes {dimension_semantics = [#tpu.dimension_semantics<parallel>, #tpu.dimension_semantics<arbitrary>], iteration_bounds = array<i64: 1, 1>, scalar_prefetch = 0 : i64, scratch_operands = 1 : i64, tpu.core_type = #tpu.core_type<tc>, window_params = [{transform_indices = @transform_0, window_bounds = array<i64: 1, 1, 16>}, {transform_indices = @transform_1, window_bounds = array<i64: 16, 32>}, {transform_indices = @transform_2, window_bounds = array<i64: 2, 32>}]} {
    %c0_i32 = arith.constant 0 : i32
    %0 = arith.cmpi eq, %arg1, %c0_i32 : i32
    %1 = arith.extui %0 : i1 to i32
    %c0_i32_0 = arith.constant 0 : i32
    %2 = arith.cmpi ne, %1, %c0_i32_0 : i32
    scf.if %2 {
      %cst_11 = arith.constant 0.000000e+00 : f32
      %18 = vector.broadcast %cst_11 : f32 to vector<2x32xf32>
      %c0_12 = arith.constant 0 : index
      %c0_13 = arith.constant 0 : index
      %19 = vector.load %arg5[%c0_12, %c0_13] : memref<2x32xf32, #tpu.memory_space<vmem>>, vector<2x32xf32>
      tpu.vector_store %arg5[%c0_12, %c0_13], %18 {strides = array<i32>} : memref<2x32xf32, #tpu.memory_space<vmem>>, vector<2x32xf32>,
    } else {
    }
    %c0 = arith.constant 0 : index
    %c0_1 = arith.constant 0 : index
    %3 = vector.load %arg3[%c0, %c0_1] : memref<16x32xf32, #tpu.memory_space<vmem>>, vector<16x32xf32>
    %c0_2 = arith.constant 0 : index
    %c0_3 = arith.constant 0 : index
    %c0_4 = arith.constant 0 : index
    %4 = vector.load %arg2[%c0_2, %c0_3, %c0_4] : memref<1x1x16xi32, #tpu.memory_space<vmem>>, vector<1x1x16xi32>
    %5 = vector.shape_cast %4 : vector<1x1x16xi32> to vector<1x16xi32>
    %6 = tpu.iota {dimensions = array<i32: 0>} : vector<2x16xi32>
    %7 = vector.broadcast %5 : vector<1x16xi32> to vector<2x16xi32>
    %8 = arith.cmpi eq, %6, %7 : vector<2x16xi32>
    %c0_5 = arith.constant 0 : index
    %c0_6 = arith.constant 0 : index
    %9 = vector.load %arg5[%c0_5, %c0_6] : memref<2x32xf32, #tpu.memory_space<vmem>>, vector<2x32xf32>
    %10 = arith.extui %8 : vector<2x16xi1> to vector<2x16xi32>
    %11 = arith.sitofp %10 : vector<2x16xi32> to vector<2x16xf32>
    %cst = arith.constant dense<0.000000e+00> : vector<2x32xf32>
    %12 = tpu.matmul %11, %3, %cst {dimension_numbers = #tpu.dot_dimension_numbers<[1], [0], [0], [1], [0, 0, 1, 1], [], []>} : vector<2x16xf32>, vector<16x32xf32>, vector<2x32xf32> -> vector<2x32xf32>
    %13 = arith.addf %9, %12 : vector<2x32xf32>
    %c0_7 = arith.constant 0 : index
    %c0_8 = arith.constant 0 : index
    %14 = vector.load %arg5[%c0_7, %c0_8] : memref<2x32xf32, #tpu.memory_space<vmem>>, vector<2x32xf32>
    tpu.vector_store %arg5[%c0_7, %c0_8], %13 {strides = array<i32>} : memref<2x32xf32, #tpu.memory_space<vmem>>, vector<2x32xf32>,
    %c0_i32_9 = arith.constant 0 : i32
    %15 = arith.cmpi eq, %arg1, %c0_i32_9 : i32
    %16 = arith.extui %15 : i1 to i32
    %c0_i32_10 = arith.constant 0 : i32
    %17 = arith.cmpi ne, %16, %c0_i32_10 : i32
    scf.if %17 {
      %c0_11 = arith.constant 0 : index
      %c0_12 = arith.constant 0 : index
      %18 = vector.load %arg5[%c0_11, %c0_12] : memref<2x32xf32, #tpu.memory_space<vmem>>, vector<2x32xf32>
      %c0_13 = arith.constant 0 : index
      %c0_14 = arith.constant 0 : index
      %19 = vector.load %arg4[%c0_13, %c0_14] : memref<2x32xf32, #tpu.memory_space<vmem>>, vector<2x32xf32>
      tpu.vector_store %arg4[%c0_13, %c0_14], %18 {strides = array<i32>} : memref<2x32xf32, #tpu.memory_space<vmem>>, vector<2x32xf32>,
    } else {
    }
    return
  }
  func.func @transform_0(%arg0: i32, %arg1: i32) -> (i32, i32, i32) {
    %c0_i32 = arith.constant 0 : i32
    %c0_i32_0 = arith.constant 0 : i32
    %c0_i32_1 = arith.constant 0 : i32
    return %arg1, %c0_i32, %c0_i32_0 : i32, i32, i32
  }
  func.func @transform_1(%arg0: i32, %arg1: i32) -> (i32, i32) {
    %c0_i32 = arith.constant 0 : i32
    return %arg1, %arg0 : i32, i32
  }
  func.func @transform_2(%arg0: i32, %arg1: i32) -> (i32, i32) {
    %c0_i32 = arith.constant 0 : i32
    %c0_i32_0 = arith.constant 0 : i32
    return %c0_i32, %arg0 : i32, i32
  }
}

</mosaic_0001>

<bundles_post_ra>
// kernel: tpu_custom_call.1
= control target key start
LH: loop header
LB: loop body
LE: loop exit
PB: predicated region body
PF: predicated region fallthrough
CT: control target
= control target key end

     0   :  { %7 = vsyncpa [#allocation4], 0  ;;  %s320_s0 = inlined_call_operand.hbm [shape: s32[1,1,16], index: 0, kind: input, shape index: {}]   ;;  %s321_s1 = inlined_call_operand.hbm [shape: f32[16,32], index: 1, kind: input, shape index: {}]   ;;  %s322_s2 = inlined_call_operand.hbm [shape: f32[2,32], index: 2, kind: output, shape index: {}]  }
   0x1   :  { %8 = vsyncpa [#allocation7], 0 }
   0x2   :  { %9 = vsyncpa [#allocation5], 0  ;;  %s251_s9 = smov [#allocation3]   ;;  %s252_s11 = smov [#allocation6]  }
   0x3   :  { %s16_s10 = sshll.u32 %s251_s9, 4  ;;  %s25_s12 = sshll.u32 %s252_s11, 4  ;;  %s17_s10 = int_to_ptr.vmem [resolvable:$true] %s16_s10  ;;  %s274_s12 = int_to_ptr.vmem [resolvable:$true] %s25_s12 }
   0x4   :  { %s179_s15 = scalar_lea.hbm %s320_s0, 16 }
   0x5   :  { %p180_p0 = scmp.ne.s32.totalorder %s320_s0, %s179_s15  ;;  %p183_p1 = scmp.lt.u32.totalorder %s179_s15, %s320_s0 }
   0x7   :  { %p185_p2 = pnand %p183_p1, %p180_p0 }
   0x9   :  { %188 = shalt.err (!%p185_p2)
}
   0xa   :  { %s189_s20 = scalar_lea.vmem %s17_s10, 16  ;;  %s193_s21 = scalar_lea.vmem %s17_s10, 32 }
   0xb   :  { %p190_p3 = scmp.ne.s32.totalorder %s17_s10, %s189_s20  ;;  %p194_p4 = scmp.lt.s32.totalorder %s17_s10, %s17_s10 }
   0xc   :  { %p195_p5 = scmp.lt.s32.totalorder %s193_s21, %s189_s20 }
   0xe   :  { %p196_p6 = por %p195_p5, %p194_p4 }
  0x10   :  { %p197_p7 = pnand %p196_p6, %p190_p3 }
  0x12   :  { %200 = shalt.err (!%p197_p7)
}
  0x13   :  { %19 = dma.hbm_to_vmem [thread:$0]  %s320_s0, 16, %s17_s10, [#allocation4]  }
  0x14   :  { %s201_s26 = scalar_lea.hbm %s321_s1, 256 }
  0x15   :  { %p202_p8 = scmp.ne.s32.totalorder %s321_s1, %s201_s26  ;;  %p205_p9 = scmp.lt.u32.totalorder %s201_s26, %s321_s1 }
  0x17   :  { %p207_p10 = pnand %p205_p9, %p202_p8 }
  0x19   :  { %210 = shalt.err (!%p207_p10)
}
  0x1a   :  { %s211_s3 = scalar_lea.vmem %s274_s12, 256  ;;  %p216_p12 = scmp.lt.s32.totalorder %s274_s12, %s274_s12 }
  0x1b   :  { %p212_p11 = scmp.ne.s32.totalorder %s274_s12, %s211_s3  ;;  %p217_p13 = scmp.lt.s32.totalorder %s211_s3, %s211_s3 }
  0x1d   :  { %p218_p0 = por %p217_p13, %p216_p12 }
  0x1f   :  { %p219_p1 = pnand %p218_p0, %p212_p11 }
  0x21   :  { %222 = shalt.err (!%p219_p1)
}
  0x22   :  { %s253_s0 = smov 128   ;;  %s254_s4 = smov 8  }
  0x23   :  { %31 = dma.hbm_to_vmem [thread:$0]  %s321_s1, 256, %s274_s12, [#allocation7], %s253_s0, %s253_s0, %s254_s4  }
  0x24   :  { %245 = dma.done.wait [#allocation4], 16  }
  0x25   :  { %246 = vsyncadd [#allocation4], 4294967280 }
  0x26   :  { %247 = dma.done.wait [#allocation7], 256  }
  0x27   :  { %248 = vsyncadd [#allocation7], 4294967040  ;;  %vm42_vm0 = vcmask 254976   ;;  %v255_v0 = vmov 0.0|0.0   ;;  %v256_v1 = vmov 0.0   ;;  %vm257_vm1 = vmmov 0  }
  0x28   :  { %168 = vmatprep.subr.bf16.mxu0 %v255_v0  ;;  %43 = vst.msk [vmem:[#allocation2] sm:$0x3] %vm42_vm0, %v256_v1  ;;  %165 = vmatprep.mubr.msk.f32.mxu0 %vm257_vm1, %v256_v1  ;;  %v47_v2 = vlaneseq  ;;  %v44_v4 = vld [vmem:[#allocation6] sm:$0xff]  ;;  %v45_v5 = vld [vmem:[#allocation6 + $0x8] sm:$0xff]  ;;  %v155_v6 = vld [vmem:[#allocation3] ss:$0 sm:$0xff] }
  0x29   :  { %v169_v7 = vpack.c.bf16 %v45_v5, %v44_v4  ;;  %vm57_vm3 = vcmask 130048   ;;  %s258_s1 = smov [#allocation8]  }
  0x2a   :  { %v48_v3 = vshrl.u32 %v47_v2, 7  ;;  %s145_s7 = sshll.u32 %s258_s1, 4  ;;  %s146_s7 = int_to_ptr.vmem [resolvable:$true] %s145_s7 }
  0x2b   :  { %170 = vmatpush3.bf16.msra.mxu0 %v169_v7  ;;  %s223_s8 = scalar_lea.vmem %s146_s7, 32  ;;  %p228_p3 = scmp.lt.s32.totalorder %s146_s7, %s146_s7 }
  0x2c   :  { %vm53_vm2 = vcmp.eq.s32.totalorder %v48_v3, %v155_v6  ;;  %p224_p2 = scmp.ne.s32.totalorder %s146_s7, %s223_s8  ;;  %p229_p4 = scmp.lt.s32.totalorder %s223_s8, %s223_s8 }
  0x2d   :  { %v156_v8 = vsel %vm53_vm2, 1.0, %v256_v1 }
  0x2e   :  { %166 = vmatmul.mubr.msk.f32.vlgmr.msra.gmra.mrb[0].mxu0 %vm57_vm3, %v156_v8  ;;  %p230_p5 = por %p229_p4, %p228_p3 }
  0x2f   :  { %v54_v9 = vld [vmem:[#allocation2] sm:$0x3] }
  0x30   :  { %p231_p6 = pnand %p230_p5, %p224_p2 }
 0x101   :  { %v127_v10 = vpop.f32.mrb[0].mxu0 }
 0x102   :  { %v131_v11 = vadd.f32 %v127_v10, %v54_v9  ;;  %v167_v12 = vpop.f32.mrb[1].mxu0 }
 0x104   :  { %133 = vst.msk [vmem:[#allocation2] sm:$0x3] %vm42_vm0, %v131_v11 }
 0x10b   :  { %v137_v13 = vld [vmem:[#allocation2] sm:$0x3] }
 0x10c   :  { %138 = vst.msk [vmem:[#allocation8] sm:$0x3] %vm42_vm0, %v137_v13 }
 0x10d   :  { %234 = shalt.err (!%p231_p6)
}
 0x10e   :  { %s235_s11 = scalar_lea.hbm %s322_s2, 32 }
 0x10f   :  { %p236_p7 = scmp.ne.s32.totalorder %s322_s2, %s235_s11  ;;  %p239_p8 = scmp.lt.u32.totalorder %s235_s11, %s322_s2 }
 0x111   :  { %p241_p9 = pnand %p239_p8, %p236_p7 }
 0x113   :  { %244 = shalt.err (!%p241_p9)
}
 0x114   :  { %148 = dma.vmem_to_hbm [thread:$0]  %s146_s7, 32, %s322_s2, [#allocation5]  }
 0x115   :  { %249 = dma.done.wait [#allocation5], 32  }
 0x116   :  { %250 = vsyncadd [#allocation5], 4294967264 }
 0x117   :  { %152 = vsyncpa [#allocation4], 1 }
 0x118   :  { %153 = vsyncpa [#allocation7], 1 }
 0x119   :  { %154 = vsyncpa [#allocation5], 1 }

</bundles_post_ra>
